<compile_context>
chip_gen: v6e
topology: v6e:2x2x1
jax: 0.10.0
libtpu: 0.0.40
codegen_flags: <defaults>
</compile_context>

<pallas_src>
import functools

import jax
import jax.numpy as jnp
from jax import lax
from jax.experimental import pallas as pl
from jax.experimental.pallas import tpu as pltpu

_LANES = 128
_SUBLANES = 8
_TILE = _LANES * _SUBLANES  # 1024 elements = one full f32 (8,128) vreg tile


def _rhythmnet_loss_kernel(packed_ref, out_ref, *, scale_l1, scale_smooth,
                           inv_ng, n_g, needs_mask):
    # packed_ref: (3, rows, 128) f32 resident in VMEM.
    #   slab 0 = resnet outputs (zero-padded)
    #   slab 1 = target         (zero-padded)
    #   slab 2 = gru outputs    (zero-padded)
    rows, lanes = packed_ref.shape[1], packed_ref.shape[2]

    r = packed_ref[0]  # (rows, lanes)
    t = packed_ref[1]
    g = packed_ref[2]

    # L1 term: padded tail is zero in BOTH r and t, so |r - t| contributes 0 there.
    abs_rt = jnp.abs(r - t)

    # Sublane-first partial reductions (VPU adds), one cross-lane XLU reduce each.
    sum_rt = jnp.sum(jnp.sum(abs_rt, axis=0, keepdims=True))

    # mean(g): padded tail is zero so the sum is exact; divide by the true length.
    sum_g = jnp.sum(jnp.sum(g, axis=0, keepdims=True))
    mean_g = sum_g * jnp.float32(inv_ng)

    # Mean absolute deviation of g; mask the padded tail only if padding exists.
    dev = jnp.abs(g - mean_g)
    if needs_mask:
        row_idx = lax.broadcasted_iota(jnp.int32, (rows, lanes), 0)
        lane_idx = lax.broadcasted_iota(jnp.int32, (rows, lanes), 1)
        flat_idx = row_idx * lanes + lane_idx
        dev = jnp.where(flat_idx < n_g, dev, jnp.float32(0.0))
    smooth_sum = jnp.sum(jnp.sum(dev, axis=0, keepdims=True))

    # Scalar epilogue: 1/N factors and lambd pre-folded into two constants.
    out_ref[0] = (sum_rt * jnp.float32(scale_l1)
                  + smooth_sum * jnp.float32(scale_smooth))


def rhythmnet_loss(resnet_outputs, gru_outputs, target, weight=100.0,
                   use_pallas=True):
    """JAX/Pallas equivalent of RhythmNetLoss(weight).forward(...).

    Returns a shape-(1,) float32 array (matching the torch module).
    """
    r = jnp.asarray(resnet_outputs, jnp.float32).reshape(-1)
    t = jnp.asarray(target, jnp.float32).reshape(-1)
    g = jnp.asarray(gru_outputs, jnp.float32).reshape(-1)
    n_rt = int(r.shape[0])
    n_g = int(g.shape[0])

    if not use_pallas:
        l1 = jnp.mean(jnp.abs(r - t))
        smooth = jnp.mean(jnp.abs(g - jnp.mean(g)))
        return (l1 + jnp.float32(weight) * smooth).reshape((1,))

    # Pack into one lane- and sublane-dense (3, rows, 128) operand -> single DMA,
    # fully unmasked (8,128)-aligned tiles in VMEM.
    n_max = max(n_rt, n_g)
    n_pad = ((n_max + _TILE - 1) // _TILE) * _TILE
    rows = n_pad // _LANES

    def pad(x):
        return jnp.pad(x, (0, n_pad - x.shape[0]))

    packed = jnp.stack([pad(r), pad(t), pad(g)]).reshape(3, rows, _LANES)

    kernel = functools.partial(
        _rhythmnet_loss_kernel,
        scale_l1=1.0 / n_rt,
        scale_smooth=float(weight) / n_g,
        inv_ng=1.0 / n_g,
        n_g=n_g,
        needs_mask=(n_g != n_pad),
    )

    out = pl.pallas_call(
        kernel,
        out_shape=jax.ShapeDtypeStruct((1,), jnp.float32),
        in_specs=[pl.BlockSpec(memory_space=pltpu.VMEM)],
        out_specs=pl.BlockSpec(memory_space=pltpu.SMEM),
    )(packed)
    # TODO(synk): if this loss is ever applied to large activations, replace the
    # full-resident design with a lane-tiled grid (>=512-wide blocks) + scratch
    # accumulators and a two-pass stream over gru_outputs (mean first, MAD second).
    return out


def _reference_loss(resnet_outputs, gru_outputs, target, weight=100.0):
    l1 = jnp.mean(jnp.abs(resnet_outputs - target))
    g = gru_outputs.reshape(-1)
    smooth = jnp.mean(jnp.abs(g - jnp.mean(g)))
    return (l1 + weight * smooth).reshape((1,))


if __name__ == "__main__":
    key = jax.random.PRNGKey(0)
    k1, k2, k3 = jax.random.split(key, 3)

    batch, seq = 2, 8
    # per-clip HR estimates / targets (typical values around 60-100 bpm)
    resnet_outputs = 70.0 + 10.0 * jax.random.normal(k1, (batch, seq), jnp.float32)
    gru_outputs = 70.0 + 10.0 * jax.random.normal(k2, (batch, seq), jnp.float32)
    target = 70.0 + 10.0 * jax.random.normal(k3, (batch, seq), jnp.float32)

    loss = rhythmnet_loss(resnet_outputs, gru_outputs, target, weight=100.0)
    jax.block_until_ready(loss)

    ref = _reference_loss(resnet_outputs, gru_outputs, target, weight=100.0)
    assert loss.shape == (1,), loss.shape
    assert jnp.allclose(loss, ref, rtol=1e-5, atol=1e-5), (loss, ref)

    print("KERNEL_OK")
</pallas_src>

<mosaic_0001>
module attributes {stable_mosaic.version = 11 : i64} {
  func.func @_rhythmnet_loss_kernel(%arg0: memref<3x8x128xf32, #tpu.memory_space<vmem>>, %arg1: memref<1xf32, #tpu.memory_space<smem>>) attributes {dimension_semantics = [], scalar_prefetch = 0 : i64, scratch_operands = 0 : i64, tpu.core_type = #tpu.core_type<tc>} {
    %c0 = arith.constant 0 : index
    %c0_0 = arith.constant 0 : index
    %c0_1 = arith.constant 0 : index
    %0 = vector.load %arg0[%c0, %c0_0, %c0_1] : memref<3x8x128xf32, #tpu.memory_space<vmem>>, vector<1x8x128xf32>
    %1 = vector.shape_cast %0 : vector<1x8x128xf32> to vector<8x128xf32>
    %c1 = arith.constant 1 : index
    %c0_2 = arith.constant 0 : index
    %c0_3 = arith.constant 0 : index
    %2 = vector.load %arg0[%c1, %c0_2, %c0_3] : memref<3x8x128xf32, #tpu.memory_space<vmem>>, vector<1x8x128xf32>
    %3 = vector.shape_cast %2 : vector<1x8x128xf32> to vector<8x128xf32>
    %c2 = arith.constant 2 : index
    %c0_4 = arith.constant 0 : index
    %c0_5 = arith.constant 0 : index
    %4 = vector.load %arg0[%c2, %c0_4, %c0_5] : memref<3x8x128xf32, #tpu.memory_space<vmem>>, vector<1x8x128xf32>
    %5 = vector.shape_cast %4 : vector<1x8x128xf32> to vector<8x128xf32>
    %6 = arith.subf %1, %3 : vector<8x128xf32>
    %7 = math.absf %6 : vector<8x128xf32>
    %cst = arith.constant dense<0.000000e+00> : vector<128xf32>
    %8 = vector.multi_reduction <add>, %7, %cst [0] : vector<8x128xf32> to vector<128xf32>
    %9 = vector.shape_cast %8 : vector<128xf32> to vector<1x128xf32>
    %10 = vector.shape_cast %9 : vector<1x128xf32> to vector<1x1x128xf32>
    %cst_6 = arith.constant dense<0.000000e+00> : vector<1xf32>
    %11 = vector.multi_reduction <add>, %10, %cst_6 [1, 2] : vector<1x1x128xf32> to vector<1xf32>
    %12 = vector.shape_cast %11 : vector<1xf32> to vector<1x1x1xf32>
    %13 = vector.extract %12[0, 0, 0] : f32 from vector<1x1x1xf32>
    %cst_7 = arith.constant dense<0.000000e+00> : vector<128xf32>
    %14 = vector.multi_reduction <add>, %5, %cst_7 [0] : vector<8x128xf32> to vector<128xf32>
    %15 = vector.shape_cast %14 : vector<128xf32> to vector<1x128xf32>
    %16 = vector.shape_cast %15 : vector<1x128xf32> to vector<1x1x128xf32>
    %cst_8 = arith.constant dense<0.000000e+00> : vector<1xf32>
    %17 = vector.multi_reduction <add>, %16, %cst_8 [1, 2] : vector<1x1x128xf32> to vector<1xf32>
    %18 = vector.shape_cast %17 : vector<1xf32> to vector<1x1x1xf32>
    %19 = vector.extract %18[0, 0, 0] : f32 from vector<1x1x1xf32>
    %cst_9 = arith.constant 6.250000e-02 : f32
    %20 = arith.mulf %19, %cst_9 : f32
    %21 = vector.broadcast %20 : f32 to vector<8x128xf32>
    %22 = arith.subf %5, %21 : vector<8x128xf32>
    %23 = math.absf %22 : vector<8x128xf32>
    %24 = tpu.iota {dimensions = array<i32: 0>} : vector<8x128xi32>
    %25 = tpu.iota {dimensions = array<i32: 1>} : vector<8x128xi32>
    %c128_i32 = arith.constant 128 : i32
    %26 = vector.broadcast %c128_i32 : i32 to vector<8x128xi32>
    %27 = arith.muli %24, %26 : vector<8x128xi32>
    %28 = arith.addi %27, %25 : vector<8x128xi32>
    %c16_i32 = arith.constant 16 : i32
    %29 = vector.broadcast %c16_i32 : i32 to vector<8x128xi32>
    %30 = arith.cmpi slt, %28, %29 : vector<8x128xi32>
    %cst_10 = arith.constant 0.000000e+00 : f32
    %31 = vector.broadcast %cst_10 : f32 to vector<8x128xf32>
    %32 = arith.select %30, %23, %31 : vector<8x128xi1>, vector<8x128xf32>
    %cst_11 = arith.constant dense<0.000000e+00> : vector<128xf32>
    %33 = vector.multi_reduction <add>, %32, %cst_11 [0] : vector<8x128xf32> to vector<128xf32>
    %34 = vector.shape_cast %33 : vector<128xf32> to vector<1x128xf32>
    %35 = vector.shape_cast %34 : vector<1x128xf32> to vector<1x1x128xf32>
    %cst_12 = arith.constant dense<0.000000e+00> : vector<1xf32>
    %36 = vector.multi_reduction <add>, %35, %cst_12 [1, 2] : vector<1x1x128xf32> to vector<1xf32>
    %37 = vector.shape_cast %36 : vector<1xf32> to vector<1x1x1xf32>
    %38 = vector.extract %37[0, 0, 0] : f32 from vector<1x1x1xf32>
    %cst_13 = arith.constant 6.250000e-02 : f32
    %39 = arith.mulf %13, %cst_13 : f32
    %cst_14 = arith.constant 6.250000e+00 : f32
    %40 = arith.mulf %38, %cst_14 : f32
    %41 = arith.addf %39, %40 : f32
    %c0_15 = arith.constant 0 : index
    %42 = memref.load %arg1[%c0_15] : memref<1xf32, #tpu.memory_space<smem>>
    memref.store %41, %arg1[%c0_15] : memref<1xf32, #tpu.memory_space<smem>>
    return
  }
}

</mosaic_0001>

<bundles_post_ra>
// kernel: tpu_custom_call.1
= control target key start
LH: loop header
LB: loop body
LE: loop exit
PB: predicated region body
PF: predicated region fallthrough
CT: control target
= control target key end

     0   :  { %6 = vsyncpa [#allocation3], 0  ;;  %s178_s0 = inlined_call_operand.hbm [shape: f32[3,8,128], index: 0, kind: input, shape index: {}]   ;;  %s179_s1 = inlined_call_operand.hbm [shape: f32[1], index: 1, kind: output, shape index: {}]  }
   0x1   :  { %7 = vsyncpa [#allocation4], 0  ;;  %s152_s6 = smov [#allocation2]  }
   0x2   :  { %s13_s7 = sshll.u32 %s152_s6, 4  ;;  %s14_s7 = int_to_ptr.vmem [resolvable:$true] %s13_s7 }
   0x3   :  { %s128_s8 = scalar_lea.vmem %s14_s7, 384  ;;  %p133_p1 = scmp.lt.s32.totalorder %s14_s7, %s14_s7 }
   0x4   :  { %p129_p0 = scmp.ne.s32.totalorder %s14_s7, %s128_s8  ;;  %p134_p2 = scmp.lt.s32.totalorder %s128_s8, %s128_s8 }
   0x6   :  { %p135_p3 = por %p134_p2, %p133_p1 }
   0x8   :  { %p136_p4 = pnand %p135_p3, %p129_p0 }
   0xa   :  { %139 = shalt.err (!%p136_p4)
}
   0xb   :  { %s153_s9 = smov 128   ;;  %s154_s10 = smov 8  }
   0xc   :  { %19 = dma.hbm_to_vmem [thread:$0]  %s178_s0, 384, %s14_s7, [#allocation3], %s153_s9, %s153_s9, %s154_s10  }
   0xd   :  { %148 = dma.done.wait [#allocation3], 384  }
   0xe   :  { %149 = vsyncadd [#allocation3], 4294966912  ;;  %v23_v0 = vld [vmem:[#allocation2] sm:$0xff]  ;;  %v25_v1 = vld [vmem:[#allocation2 + $0x8] sm:$0xff]  ;;  %vm36_vm0 = vcmask 1040384   ;;  %v67_v33 = vlaneseq  ;;  %s155_s19 = smov [#allocation5]  }
   0xf   :  { %v27_v2 = vld [vmem:[#allocation2 + $0x10] sm:$0xff]  ;;  %v28_v3 = vsub.f32 %v23_v0, %v25_v1 }
  0x10   :  { %v47_v4 = vrot.slane %v27_v2, 4  ;;  %v68_v34 = vshrl.u32 %v67_v33, 7  ;;  %v70_v35 = vand.u32 127, %v67_v33 }
  0x11   :  { %v29_v5 = vand.u32 2147483647, %v28_v3 }
  0x12   :  { %v48_v6 = vadd.f32 %v47_v4, %v27_v2  ;;  %v71_v36 = vmul.u32 128, %v68_v34 }
  0x13   :  { %v30_v7 = vrot.slane %v29_v5, 4 }
  0x14   :  { %v49_v8 = vrot.slane %v48_v6, 2  ;;  %v72_v37 = vadd.s32 %v71_v36, %v70_v35 }
  0x15   :  { %v31_v9 = vadd.f32 %v30_v7, %v29_v5 }
  0x16   :  { %v50_v10 = vadd.f32 %v49_v8, %v48_v6  ;;  %vm73_vm1 = vcmp.lt.s32.totalorder %v72_v37, 16 }
  0x17   :  { %v32_v11 = vrot.slane %v31_v9, 2 }
  0x18   :  { %v51_v13 = vrot.slane %v50_v10, 1 }
  0x19   :  { %v33_v12 = vadd.f32 %v32_v11, %v31_v9 }
  0x1a   :  { %v52_v16 = vadd.f32 %v51_v13, %v50_v10 }
  0x1b   :  { %v34_v14 = vrot.slane %v33_v12, 1 }
  0x1c   :  { %v53_v18 = vsel %vm36_vm0, %v52_v16, 0.0 }
  0x1d   :  { %v35_v15 = vadd.f32 %v34_v14, %v33_v12 }
  0x1f   :  { %v37_v17 = vsel %vm36_vm0, %v35_v15, 0.0 }
  0x20   :  { %38 = vadd.xlane.f32.xlu0 %v37_v17 }
  0x24   :  { %54 = vadd.xlane.f32.xlu0 %v53_v18 }
  0xa9   :  { %v39_v19 = vpop.xlane.xlu0 %38 }
  0xaa   :  { %v40_v20 = vrot.slane %v39_v19, 4 }
  0xac   :  { %v41_v21 = vadd.f32 %v40_v20, %v39_v19 }
  0xad   :  { %v55_v22 = vpop.xlane.xlu0 %54 }
  0xae   :  { %v42_v23 = vrot.slane %v41_v21, 2  ;;  %v56_v24 = vrot.slane %v55_v22, 4 }
  0xb0   :  { %v57_v25 = vadd.f32 %v56_v24, %v55_v22  ;;  %v43_v26 = vadd.f32 %v42_v23, %v41_v21 }
  0xb2   :  { %v58_v27 = vrot.slane %v57_v25, 2  ;;  %v44_v28 = vrot.slane %v43_v26, 1 }
  0xb4   :  { %v59_v29 = vadd.f32 %v58_v27, %v57_v25  ;;  %v45_v30 = vadd.f32 %v44_v28, %v43_v26 }
  0xb6   :  { %110 = vpush %v45_v30  ;;  %v60_v31 = vrot.slane %v59_v29, 1 }
  0xb8   :  { %v61_v32 = vadd.f32 %v60_v31, %v59_v29 }
  0xba   :  { %112 = vpush %v61_v32 }
  0xe7   :  { %s171_s0 = spop %110 }
  0xe8   :  { %s91_s15 = smul.f32 0.0625, %s171_s0 }
  0xeb   :  { %s113_s13 = spop %112 }
  0xec   :  { %s63_s14 = smul.f32 0.0625, %s113_s13 }
  0xee   :  { %v64_v38 = vstv %s63_s14 }
  0xef   :  { %v65_v39 = vsub.f32 %v27_v2, %v64_v38 }
  0xf1   :  { %v66_v40 = vand.u32 2147483647, %v65_v39 }
  0xf3   :  { %v74_v41 = vsel %vm73_vm1, %v66_v40, 0.0 }
  0xf4   :  { %v75_v42 = vrot.slane %v74_v41, 4 }
  0xf6   :  { %v76_v43 = vadd.f32 %v75_v42, %v74_v41 }
  0xf8   :  { %v77_v44 = vrot.slane %v76_v43, 2 }
  0xfa   :  { %v78_v45 = vadd.f32 %v77_v44, %v76_v43 }
  0xfc   :  { %v79_v46 = vrot.slane %v78_v45, 1 }
  0xfe   :  { %v80_v47 = vadd.f32 %v79_v46, %v78_v45 }
 0x100   :  { %v81_v48 = vsel %vm36_vm0, %v80_v47, 0.0 }
 0x101   :  { %82 = vadd.xlane.f32.xlu1 %v81_v48 }
 0x18a   :  { %v83_v49 = vpop.xlane.xlu1 %82 }
 0x18b   :  { %v84_v50 = vrot.slane %v83_v49, 4 }
 0x18d   :  { %v85_v51 = vadd.f32 %v84_v50, %v83_v49 }
 0x18f   :  { %v86_v52 = vrot.slane %v85_v51, 2 }
 0x191   :  { %v87_v53 = vadd.f32 %v86_v52, %v85_v51 }
 0x193   :  { %v88_v54 = vrot.slane %v87_v53, 1 }
 0x195   :  { %v89_v55 = vadd.f32 %v88_v54, %v87_v53 }
 0x197   :  { %114 = vpush %v89_v55 }
 0x1c8   :  { %s115_s16 = spop %114 }
 0x1c9   :  { %s92_s17 = smul.f32 6.25, %s115_s16 }
 0x1cb   :  { %s93_s18 = sadd.f32 %s92_s17, %s91_s15 }
 0x1cd   :  { %95 = sst [smem:[#allocation5]] %s93_s18 }
 0x1ce   :  { %103 = dma.smem_to_hbm %s155_s19, 16, %s179_s1, [#allocation4]  }
 0x1cf   :  { %150 = dma.done.wait [#allocation4], 16  }
 0x1d0   :  { %151 = vsyncadd [#allocation4], 4294967280 }
 0x1d1   :  { %107 = sfence }
 0x1d2   :  { %108 = vsyncpa [#allocation3], 1 }
 0x1d3   :  { %109 = vsyncpa [#allocation4], 1 }

</bundles_post_ra>
